<compile_context>
chip_gen: v7x
topology: tpu7x:2x2x1
jax: 0.10.0
libtpu: 0.0.40
codegen_flags: <defaults>
</compile_context>

<pallas_src>
import functools
import math

import jax
import jax.numpy as jnp
from jax.experimental import pallas as pl
from jax.experimental.pallas import tpu as pltpu

# x[tm, tk] . w[tn, tk] contracted on the last dim of both operands (x @ w.T).
_NT_DIMS = (((1,), (1,)), ((), ()))


def _round_up(a, b):
    return ((a + b - 1) // b) * b


def _masked_operands(x_ref, w_ref, k_rem):
    """Load the current tiles; zero the K tail on the last k step if K is ragged.

    Both operands are masked so OOB garbage never reaches the accumulation
    (0 * garbage would still be unsafe if only one side were masked).
    """
    x = x_ref[...]
    w = w_ref[...]
    if k_rem:  # static: only emitted when K % tk != 0
        is_last = pl.program_id(2) == pl.num_programs(2) - 1
        limit = jnp.where(is_last, k_rem, x.shape[1])
        x = jnp.where(jax.lax.broadcasted_iota(jnp.int32, x.shape, 1) < limit, x, 0)
        w = jnp.where(jax.lax.broadcasted_iota(jnp.int32, w.shape, 1) < limit, w, 0)
    return x, w


def _linear_kernel_f32out(x_ref, w_ref, o_ref, *, k_rem, precision):
    """f32 output: accumulate directly into the resident output block (no scratch)."""
    @pl.when(pl.program_id(2) == 0)
    def _():
        o_ref[...] = jnp.zeros_like(o_ref)

    x, w = _masked_operands(x_ref, w_ref, k_rem)
    o_ref[...] += jax.lax.dot_general(
        x, w, _NT_DIMS, preferred_element_type=jnp.float32, precision=precision
    )


def _linear_kernel_castout(x_ref, w_ref, o_ref, acc_ref, *, k_rem, precision):
    """Low-precision output: f32 VMEM accumulator, single cast on the last k step."""
    @pl.when(pl.program_id(2) == 0)
    def _():
        acc_ref[...] = jnp.zeros_like(acc_ref)

    x, w = _masked_operands(x_ref, w_ref, k_rem)
    acc_ref[...] += jax.lax.dot_general(
        x, w, _NT_DIMS, preferred_element_type=jnp.float32, precision=precision
    )

    @pl.when(pl.program_id(2) == pl.num_programs(2) - 1)
    def _():
        o_ref[...] = acc_ref[...].astype(o_ref.dtype)


@functools.partial(
    jax.jit, static_argnames=("tm", "tn", "tk", "compute_dtype", "precision")
)
def linear_pallas(x, w, *, tm=512, tn=512, tk=1024,
                  compute_dtype=jnp.bfloat16, precision=None):
    """y = x @ w^T  (no bias), matching F.linear(x, w, None).

    x: [..., K], w: [N, K]  ->  y: [..., N]  (output dtype == x.dtype)

    compute_dtype: MXU operand dtype.  Defaults to bf16 (MXU-native on all TPU
      generations, half the DMA bytes).  Pass the weight already in this dtype to
      make the wrapper cast a no-op across repeated calls.  compute_dtype=None
      keeps the input dtype; for a strict full-precision f32 contraction also
      pass precision=jax.lax.Precision.HIGHEST (the PyTorch module's forward is
      full precision -- the quantizer only touches the backward pass).
    """
    *lead, K = x.shape
    N, K_w = w.shape
    assert K == K_w, (K, K_w)
    M = max(1, math.prod(lead))
    out_dtype = x.dtype

    cdt = compute_dtype if compute_dtype is not None else jnp.promote_types(x.dtype, w.dtype)
    x2 = x.reshape(M, K).astype(cdt)   # no-op when already cdt
    w2 = w.astype(cdt)                 # pass w pre-cast to skip this per call

    in_isz = jnp.dtype(cdt).itemsize
    out_isz = jnp.dtype(out_dtype).itemsize
    sub = {4: 8, 2: 16, 1: 32}.get(in_isz, 8)   # sublane packing of compute dtype

    # ---- tile selection: cap tiles, keep (sub, 128) alignment; no HBM padding ----
    tm = max(sub, min(tm, _round_up(M, sub)))
    tn = max(128, min(tn, _round_up(N, 128)))
    tk = max(128, min(tk, _round_up(K, 128)))
    # v7x has 2 TensorCores: make sure the parallel part of the grid has >= 2 blocks.
    if pl.cdiv(M, tm) * pl.cdiv(N, tn) < 2:
        if N > 128:
            tn = _round_up(pl.cdiv(N, 2), 128)
        elif M > sub:
            tm = _round_up(pl.cdiv(M, 2), sub)

    grid = (pl.cdiv(M, tm), pl.cdiv(N, tn), pl.cdiv(K, tk))
    k_rem = K % tk  # ragged contraction tail -> zero-masked in-kernel

    if out_dtype == jnp.float32:
        kernel = functools.partial(_linear_kernel_f32out, k_rem=k_rem, precision=precision)
        scratch_shapes = []
        acc_bytes = 0
    else:
        kernel = functools.partial(_linear_kernel_castout, k_rem=k_rem, precision=precision)
        scratch_shapes = [pltpu.VMEM((tm, tn), jnp.float32)]
        acc_bytes = tm * tn * 4

    # Double-buffered in/out tiles + accumulator + headroom for Mosaic internal
    # scratch; capped at 48 MiB so it stays safely below v7x's 64 MiB physical VMEM.
    vmem_bytes = 2 * (tm * tk + tn * tk) * in_isz + 2 * tm * tn * out_isz + acc_bytes
    vmem_limit = min(48 * 1024 * 1024,
                     max(vmem_bytes + 8 * 1024 * 1024, 16 * 1024 * 1024))

    cost = pl.CostEstimate(
        flops=2 * M * N * K,
        transcendentals=0,
        bytes_accessed=(M * K + N * K) * in_isz + M * N * out_isz,
    )

    y2 = pl.pallas_call(
        kernel,
        out_shape=jax.ShapeDtypeStruct((M, N), out_dtype),
        grid_spec=pltpu.PrefetchScalarGridSpec(
            num_scalar_prefetch=0,
            grid=grid,
            in_specs=[
                pl.BlockSpec((tm, tk), lambda i, j, k: (i, k)),
                # weight stays [N, K]: stream (j, k) tiles and contract on its
                # last (lane) dim in-kernel -- no transpose anywhere.
                pl.BlockSpec((tn, tk), lambda i, j, k: (j, k)),
            ],
            out_specs=pl.BlockSpec((tm, tn), lambda i, j, k: (i, j)),
            scratch_shapes=scratch_shapes,
        ),
        compiler_params=pltpu.CompilerParams(
            dimension_semantics=("parallel", "parallel", "arbitrary"),
            vmem_limit_bytes=vmem_limit,
        ),
        cost_estimate=cost,
    )(x2, w2)

    return y2.reshape(*lead, N)


if __name__ == "__main__":
    key = jax.random.PRNGKey(0)
    kx, kw, kx2, kw2 = jax.random.split(key, 4)

    # Shapes consistent with a Linear layer inside QEQWtt_QEtQXtt_Scheme.forward:
    # x: [batch=2, seq=8, in_features=128], w: [out_features=256, in_features=128]
    B, S, K, N = 2, 8, 128, 256
    x = jax.random.normal(kx, (B, S, K), dtype=jnp.float32)
    bound = 1.0 / math.sqrt(K)
    w = jax.random.uniform(kw, (N, K), dtype=jnp.float32, minval=-bound, maxval=bound)
    y_ref = jnp.einsum("bsk,nk->bsn", x, w)

    # 1) Recommended fast path: bf16 MXU compute (default); weight passed already
    #    in bf16 so the wrapper cast is a no-op (no extra HBM pass per call).
    y_fast = linear_pallas(x, w.astype(jnp.bfloat16))
    jax.block_until_ready(y_fast)
    assert y_fast.shape == (B, S, N), y_fast.shape
    assert y_fast.dtype == x.dtype, y_fast.dtype
    assert jnp.allclose(y_fast, y_ref, atol=5e-2, rtol=5e-2), float(
        jnp.max(jnp.abs(y_fast - y_ref)))

    # 2) Input-dtype-preserving path (the module's unquantized forward).
    y_f32 = linear_pallas(x, w, compute_dtype=None)
    jax.block_until_ready(y_f32)
    assert y_f32.shape == (B, S, N), y_f32.shape
    assert jnp.allclose(y_f32, y_ref, atol=1e-3, rtol=1e-3), float(
        jnp.max(jnp.abs(y_f32 - y_ref)))

    # 3) Ragged shapes: exercises the in-kernel K-tail masking and Pallas
    #    edge-block clipping on M/N (no HBM padding anywhere).
    B2, S2, K2, N2 = 3, 5, 200, 384
    x2 = jax.random.normal(kx2, (B2, S2, K2), dtype=jnp.float32)
    w2 = jax.random.uniform(kw2, (N2, K2), dtype=jnp.float32,
                            minval=-1.0 / math.sqrt(K2), maxval=1.0 / math.sqrt(K2))
    y2_ref = jnp.einsum("bsk,nk->bsn", x2, w2)
    y2 = linear_pallas(x2, w2, compute_dtype=None)
    jax.block_until_ready(y2)
    assert y2.shape == (B2, S2, N2), y2.shape
    assert jnp.allclose(y2, y2_ref, atol=1e-3, rtol=1e-3), float(
        jnp.max(jnp.abs(y2 - y2_ref)))

    # TODO(synk): the quantized backward (g_quantizer applied to e / w.T / x.T for
    # grad_x / grad_w) is autograd-only and g_quantizer is None in the module; only
    # the forward-pass semantics are implemented here.
    print("KERNEL_OK")
</pallas_src>

<mosaic_0001>
module attributes {stable_mosaic.version = 11 : i64} {
  func.func @_linear_kernel_f32out(%arg0: i32, %arg1: i32, %arg2: i32, %arg3: memref<16x128xbf16, #tpu.memory_space<vmem>>, %arg4: memref<128x128xbf16, #tpu.memory_space<vmem>>, %arg5: memref<16x128xf32, #tpu.memory_space<vmem>>) attributes {dimension_semantics = [#tpu.dimension_semantics<parallel>, #tpu.dimension_semantics<parallel>, #tpu.dimension_semantics<arbitrary>], iteration_bounds = array<i64: 1, 2, 1>, scalar_prefetch = 0 : i64, scratch_operands = 0 : i64, tpu.core_type = #tpu.core_type<tc>, window_params = [{transform_indices = @transform_0, window_bounds = array<i64: 16, 128>}, {transform_indices = @transform_1, window_bounds = array<i64: 128, 128>}, {transform_indices = @transform_2, window_bounds = array<i64: 16, 128>}]} {
    %c0_i32 = arith.constant 0 : i32
    %0 = arith.cmpi eq, %arg2, %c0_i32 : i32
    %1 = arith.extui %0 : i1 to i32
    %c0_i32_0 = arith.constant 0 : i32
    %2 = arith.cmpi ne, %1, %c0_i32_0 : i32
    scf.if %2 {
      %cst_8 = arith.constant 0.000000e+00 : f32
      %9 = vector.broadcast %cst_8 : f32 to vector<16x128xf32>
      %c0_9 = arith.constant 0 : index
      %c0_10 = arith.constant 0 : index
      %10 = vector.load %arg5[%c0_9, %c0_10] : memref<16x128xf32, #tpu.memory_space<vmem>>, vector<16x128xf32>
      tpu.vector_store %arg5[%c0_9, %c0_10], %9 {strides = array<i32>} : memref<16x128xf32, #tpu.memory_space<vmem>>, vector<16x128xf32>,
    } else {
    }
    %c0 = arith.constant 0 : index
    %c0_1 = arith.constant 0 : index
    %3 = vector.load %arg3[%c0, %c0_1] : memref<16x128xbf16, #tpu.memory_space<vmem>>, vector<16x128xbf16>
    %c0_2 = arith.constant 0 : index
    %c0_3 = arith.constant 0 : index
    %4 = vector.load %arg4[%c0_2, %c0_3] : memref<128x128xbf16, #tpu.memory_space<vmem>>, vector<128x128xbf16>
    %c0_4 = arith.constant 0 : index
    %c0_5 = arith.constant 0 : index
    %5 = vector.load %arg5[%c0_4, %c0_5] : memref<16x128xf32, #tpu.memory_space<vmem>>, vector<16x128xf32>
    %cst = arith.constant dense<0.000000e+00> : vector<16x128xf32>
    %6 = tpu.matmul %3, %4, %cst {dimension_numbers = #tpu.dot_dimension_numbers<[1], [1], [0], [0], [0, 0, 1, 0], [], []>} : vector<16x128xbf16>, vector<128x128xbf16>, vector<16x128xf32> -> vector<16x128xf32>
    %7 = arith.addf %5, %6 : vector<16x128xf32>
    %c0_6 = arith.constant 0 : index
    %c0_7 = arith.constant 0 : index
    %8 = vector.load %arg5[%c0_6, %c0_7] : memref<16x128xf32, #tpu.memory_space<vmem>>, vector<16x128xf32>
    tpu.vector_store %arg5[%c0_6, %c0_7], %7 {strides = array<i32>} : memref<16x128xf32, #tpu.memory_space<vmem>>, vector<16x128xf32>,
    return
  }
  func.func @transform_0(%arg0: i32, %arg1: i32, %arg2: i32) -> (i32, i32) {
    %c0_i32 = arith.constant 0 : i32
    return %arg0, %arg2 : i32, i32
  }
  func.func @transform_1(%arg0: i32, %arg1: i32, %arg2: i32) -> (i32, i32) {
    %c0_i32 = arith.constant 0 : i32
    return %arg1, %arg2 : i32, i32
  }
  func.func @transform_2(%arg0: i32, %arg1: i32, %arg2: i32) -> (i32, i32) {
    %c0_i32 = arith.constant 0 : i32
    return %arg0, %arg1 : i32, i32
  }
}

</mosaic_0001>

<bundles_post_ra>
// kernel: linear_pallas.1
= control target key start
LH: loop header
LB: loop body
LE: loop exit
PB: predicated region body
PF: predicated region fallthrough
CT: control target
= control target key end

     0   :  { %7 = vsyncpa [#allocation3], 0  ;;  %s918_s0 = inlined_call_operand.vmem [shape: bf16[16,128], index: 0, kind: input, shape index: {}]   ;;  %s919_s1 = inlined_call_operand.hbm [shape: bf16[256,128], index: 1, kind: input, shape index: {}]   ;;  %s920_s2 = inlined_call_operand.hbm [shape: f32[16,256], index: 2, kind: output, shape index: {}]  }
   0x1   :  { %9 = vsyncpa [#allocation3 + $0x1], 0 }
   0x2   :  { %10 = vsyncpa [#allocation4], 0 }
   0x3   :  { %12 = vsyncpa [#allocation4 + $0x1], 0  ;;  %s739_s9 = smov 0   ;;  %s741_s10 = smov 0  }
   0x4   :  { %s743_s11 = smov 0   ;;  %s745_s12 = smov 0  }
   0x5   :  { %s747_s13 = smov 0   ;;  %s749_s14 = smov 0  }
   0x6 LB: > { %s469_s15 = sadd.s32 4294967295, %s713_s14   ;;  %s470_s16 = sadd.s32 4294967294, %s713_s14   ;;  %s713_s14 = sphi %s749_s14, %s18_s14   ;;  %s709_s13 = sphi %s747_s13, %s935_s13   ;;  %s705_s12 = sphi %s745_s12, %s934_s12   ;;  %s701_s11 = sphi %s743_s11, %s933_s11   ;;  %s697_s10 = sphi %s741_s10, %s932_s10   ;;  %s693_s9 = sphi %s739_s9, %s931_s9  }
   0x7   : > { %s33_s17 = sadd.s32 1, %s709_s13  ;;  %s74_s18 = sadd.s32 1, %s701_s11 }
   0x8   : > { %p35_p0 = scmp.ge.s32.totalorder %s33_s17, 2  ;;  %p81_p1 = scmp.ne.s32.totalorder %s701_s11, %s697_s10 }
   0x9   : > { %p82_p2 = scmp.eq.s32.totalorder %s713_s14, 0  ;;  %p87_p3 = scmp.ne.s32.totalorder %s697_s10, %s693_s9 }
   0xa   : > { %s937_s17 = smov (%p35_p0, %s33_s17), 0  ;;  %p88_p5 = scmp.eq.s32.totalorder %s469_s15, 0 }
   0xb   : > { %p780_p4 = por %p82_p2, %p81_p1  ;;  %s69_s20 = ssub.s32 %s709_s13, %s937_s17 }
   0xc   : > { %p113_p6 = scmp.eq.s32.totalorder %s469_s15, 1  ;;  %p72_p7 = scmp.eq.s32.totalorder %s69_s20, 0 }
   0xd   : > { %p786_p8 = por %p88_p5, %p87_p3  ;;  %p119_p10 = scmp.eq.s32.totalorder %s470_s16, 1 }
   0xe   : > { %p790_p9 = por %p113_p6, %p81_p1  ;;  %p535_p13 = scmp.lt.s32.totalorder %s713_s14, 2 }
   0xf   : > { %s795_s23 = scalar_select %p72_p7, %s701_s11, %s74_s18  }
  0x10   : > { %s924_s22 = scalar_select %p790_p9, 1, 0 }
  0x11   : > { %p797_p11 = por %p119_p10, %p87_p3  ;;  %s151_s25 = sand.u32 1, %s701_s11  }
  0x12   : > { %s474_s26 = sshll.u32 %s151_s25, 6  ;;  %s493_s27 = sshll.u32 %s709_s13, 10 }
  0x13   : > { %s925_s24 = scalar_select %p797_p11, 1, 0 }
  0x14   : > { %s808_s30 = scalar_lea.hbm %s919_s1, %s493_s27  ;;  %s155_s3 = scalar_lea.vmem [#allocation2], %s474_s26 }
  0x15   : > { %s163_s4 = sshll.u32 %s155_s3, 4  ;;  %p814_p0 = pnand %p535_p13, %p780_p4  ;;  %s810_s4 = int_to_ptr.vmem [resolvable:$true] %s163_s4 }
  0x16   : > { %s819_s6 = scalar_lea.sflag [#allocation3], %s151_s25  ;;  %s601_s7 = scalar_lea.hbm %s808_s30, 1024 }
  0x17   : > { %p602_p2 = scmp.ne.s32.totalorder %s808_s30, %s601_s7  ;;  %p603_p3 = pneg %p814_p0 }
  0x18   : > { %s606_s16 = scalar_lea.hbm %s919_s1, 2048  ;;  %p607_p4 = scmp.lt.u32.totalorder %s808_s30, %s919_s1 }
  0x19   : > { %p604_p5 = pnand %p603_p3, %p602_p2  ;;  %p608_p7 = scmp.lt.u32.totalorder %s606_s16, %s601_s7 }
  0x1a   : > { %p610_p13 = scmp.lt.u32.totalorder %s601_s7, %s808_s30 }
  0x1b   : > { %p605_p6 = pneg %p604_p5  ;;  %p609_p10 = por %p608_p7, %p607_p4 }
  0x1d   : > { %p611_p12 = por %p610_p13, %p609_p10 }
  0x1f   : > { %p612_p1 = pnand %p611_p12, %p605_p6 }
  0x21   : > { %615 = shalt.err (!%p612_p1)
}
  0x22   : > { %s616_s20 = scalar_lea.vmem %s810_s4, 1024  ;;  %s715_s25 = smov [#allocation2]  }
  0x23   : > { %p617_p2 = scmp.ne.s32.totalorder %s810_s4, %s616_s20  ;;  %s621_s26 = sshll.u32 %s715_s25, 4  ;;  %s622_s26 = int_to_ptr.vmem [resolvable:$false] %s621_s26 }
  0x24   : > { %s623_s27 = scalar_lea.vmem %s622_s26, 2048  ;;  %p624_p9 = scmp.lt.s32.totalorder %s810_s4, %s622_s26 }
  0x25   : > { %p619_p5 = pnand %p617_p2, %p603_p3  ;;  %p625_p4 = scmp.lt.s32.totalorder %s623_s27, %s616_s20 }
  0x27   : > { %p620_p11 = pneg %p619_p5  ;;  %p626_p7 = por %p625_p4, %p624_p9 }
  0x29   : > { %p627_p10 = pnand %p626_p7, %p620_p11 }
  0x2b   : > { %630 = shalt.err (!%p627_p10)
}
  0x2c   : > { %s716_s28 = smov 64   ;;  %s717_s29 = smov 4  }
  0x2d   : > { %530 = dma.hbm_to_vmem [thread:$0]  (!%p814_p0), %s808_s30, 1024, %s810_s4, %s819_s6, %s716_s28, %s716_s28, %s717_s29  }
  0x2e   : > { %p171_p12 = scmp.lt.s32.totalorder %s713_s14, 3  ;;  %p927_p1 = scmp.ge.s32.totalorder %s713_s14, 1 }
  0x30   : > { %p172_p3 = pnand %p927_p1, %p171_p12 }
  0x31   : > { %s851_s3 = sand.u32 (!%p172_p3), 1, %s697_s10  }
  0x32   : > { %175 = sbr.rel (%p172_p3) target bundleno = 353 (0x161), region = 28  ;;  %s478_s7 = sshll.u32 (!%p172_p3), %s851_s3, 6 }
  0x33   : > { %s178_s8 = scalar_lea.sflag (!%p172_p3), [#allocation3], %s851_s3  ;;  %s181_s15 = scalar_lea.vmem (!%p172_p3), [#allocation2], %s478_s7 }
  0x39   : > { %684 = dma.done.wait (%p786_p8), %s178_s8, 1024  }
  0x3a   : > { %686 = vsyncadd (%p786_p8), %s178_s8, 4294966272  ;;  %v718_v0 = vmov 0.0   ;;  %vm719_vm0 = vmmov 0   ;;  %v592_v1 = vld [vmem:[%s181_s15] sm:$0xff]   ;;  %v593_v2 = vld [vmem:[%s181_s15 + $0x8] sm:$0xff]   ;;  %s479_s4 = sshll.u32 %s851_s3, 4 }
  0x3b   : > { %503 = vmatprep.subr.bf16.mxu0 %v718_v0  ;;  %519 = vmatprep.mubr.msk.bf16.mxu0 %vm719_vm0, %v718_v0  ;;  %v594_v3 = vld [vmem:[%s181_s15 + $0x10] sm:$0xff]   ;;  %v595_v4 = vld [vmem:[%s181_s15 + $0x18] sm:$0xff]   ;;  %v596_v5 = vld [vmem:[%s181_s15 + $0x20] sm:$0xff]   ;;  %s490_s5 = sshll.u32 %s705_s12, 7  ;;  %s209_s6 = scalar_lea.vmem [#allocation5], %s479_s4 }
  0x3c   : > { %504 = vmatpush3.bf16.xpose.msra.mxu0 %v592_v1  ;;  %v597_v6 = vld [vmem:[%s181_s15 + $0x28] sm:$0xff]   ;;  %v598_v7 = vld [vmem:[%s181_s15 + $0x30] sm:$0xff]   ;;  %v599_v8 = vld [vmem:[%s181_s15 + $0x38] sm:$0xff]   ;;  %s363_s16 = sshll.u32 %s209_s6, 4  ;;  %s867_s20 = scalar_lea.hbm %s920_s2, %s490_s5  ;;  %s869_s16 = int_to_ptr.vmem [resolvable:$true] %s363_s16 }
  0x3d   : > { %505 = vmatprep.subr.bf16.mxu0 %v718_v0  ;;  %v600_v9 = vld [vmem:[%s918_s0] sm:$0xff]   ;;  %s348_s25 = scalar_lea.sflag [#allocation4], %s851_s3  ;;  %s631_s12 = scalar_lea.vmem %s869_s16, 256 }
  0x3e   : > { %p632_p8 = scmp.ne.s32.totalorder %s869_s16, %s631_s12  ;;  %p928_p9 = scmp.ne.s32.totalorder %s924_s22, 0 }
  0x3f   : > { %s720_s26 = smov [#allocation5]  }
  0x40   : > { %p633_p11 = pnand %p632_p8, %p928_p9  ;;  %s635_s27 = sshll.u32 %s720_s26, 4  ;;  %s636_s27 = int_to_ptr.vmem [resolvable:$false] %s635_s27 }
  0x41   : > { %s637_s28 = scalar_lea.vmem %s636_s27, 512  ;;  %p638_p6 = scmp.lt.s32.totalorder %s869_s16, %s636_s27 }
  0x42   : > { %p634_p0 = pneg %p633_p11  ;;  %p639_p13 = scmp.lt.s32.totalorder %s637_s28, %s631_s12 }
  0x44   : > { %506 = vmatpush3.bf16.xpose.msra.mxu0 %v593_v2  ;;  %p640_p2 = por %p639_p13, %p638_p6 }
  0x45   : > { %507 = vmatprep.subr.bf16.mxu0 %v718_v0 }
  0x46   : > { %p641_p5 = pnand %p640_p2, %p634_p0 }
  0x4c   : > { %508 = vmatpush3.bf16.xpose.msra.mxu0 %v594_v3 }
  0x4d   : > { %509 = vmatprep.subr.bf16.mxu0 %v718_v0 }
  0x54   : > { %510 = vmatpush3.bf16.xpose.msra.mxu0 %v595_v4 }
  0x55   : > { %511 = vmatprep.subr.bf16.mxu0 %v718_v0 }
  0x5c   : > { %512 = vmatpush3.bf16.xpose.msra.mxu0 %v596_v5 }
  0x5d   : > { %513 = vmatprep.subr.bf16.mxu0 %v718_v0 }
  0x64   : > { %514 = vmatpush3.bf16.xpose.msra.mxu0 %v597_v6 }
  0x65   : > { %515 = vmatprep.subr.bf16.mxu0 %v718_v0 }
  0x6c   : > { %516 = vmatpush3.bf16.xpose.msra.mxu0 %v598_v7 }
  0x6d   : > { %517 = vmatprep.subr.bf16.mxu0 %v718_v0 }
  0x74   : > { %518 = vmatpush3.bf16.xpose.msra.mxu0 %v599_v8 }
  0x7b   : > { %520 = vmatmul.mubr.bf16.vlgmr.msra.gmra.mrb[0].mxu0 %v600_v9 }
 0x14e   : > { %v336_v10 = vpop.f32.mrb[0].mxu0 }
 0x14f   : > { %v521_v11 = vpop.f32.mrb[1].mxu0  ;;  %345 = vst [vmem:[%s209_s6] sm:$0xff] %v336_v10 }
 0x150   : > { %v339_v12 = vpop.f32.mrb[2].mxu0 }
 0x151   : > { %v522_v13 = vpop.f32.mrb[3].mxu0  ;;  %346 = vst [vmem:[%s209_s6 + $0x8] sm:$0xff] %v339_v12 }
 0x152   : > { %644 = shalt.err (!%p641_p5)
}
 0x153   : > { %s645_s29 = scalar_lea.hbm %s867_s20, 256  ;;  %s649_s15 = scalar_lea.hbm %s920_s2, 512 }
 0x154   : > { %p646_p4 = scmp.ne.s32.totalorder %s867_s20, %s645_s29  ;;  %p650_p12 = scmp.lt.u32.totalorder %s867_s20, %s920_s2 }
 0x155   : > { %p651_p1 = scmp.lt.u32.totalorder %s649_s15, %s645_s29  ;;  %p653_p8 = scmp.lt.u32.totalorder %s645_s29, %s867_s20 }
 0x156   : > { %p647_p7 = pnand %p646_p4, %p928_p9 }
 0x157   : > { %p652_p3 = por %p651_p1, %p650_p12 }
 0x158   : > { %p648_p10 = pneg %p647_p7 }
 0x159   : > { %p654_p11 = por %p653_p8, %p652_p3 }
 0x15b   : > { %p655_p0 = pnand %p654_p11, %p648_p10 }
 0x15d   : > { %658 = shalt.err (!%p655_p0)
}
 0x15e   : > { %s721_s4 = smov 128   ;;  %s722_s5 = smov 256  }
 0x15f   : > { %s723_s6 = smov 8  }
 0x160   : > { %525 = dma.vmem_to_hbm [thread:$0]  (%p928_p9), %s869_s16, 256, %s867_s20, %s348_s25, %s721_s4, %s722_s5, %s723_s6  }
 0x161 PF: > { %s378_s18 = sand.u32 1, %s693_s9   ;;  %p929_p6 = scmp.ne.s32.totalorder %s925_s24, 0 }
 0x162   : > { %p930_p13 = scmp.ge.s32.totalorder %s713_s14, 2  ;;  %s379_s19 = scalar_lea.sflag [#allocation4], %s378_s18 }
 0x164   : > { %p532_p2 = pnand %p930_p13, %p929_p6 }
 0x166   : > { %688 = dma.done.wait (!%p532_p2), %s379_s19, 256  }
 0x167   : > { %690 = vsyncadd (!%p532_p2), %s379_s19, 4294967040  ;;  %s18_s14 = sadd.s32 1, %s713_s14   ;;  %s931_s9 = smov %s697_s10 }
 0x168   : > { %p15_p5 = scmp.ge.s32.totalorder %s18_s14, 4   ;;  %s932_s10 = smov %s701_s11 }
 0x169   : > { %s933_s11 = smov %s795_s23  ;;  %s934_s12 = smov %s709_s13 }
 0x16a   : > { %s935_s13 = smov %s937_s17  ;;  %17 = sbr.rel (!%p15_p5) target bundleno = 6 (0x6), region = 80 }
 0x171   :  { %384 = vsyncpa [#allocation3], 1 }
 0x172   :  { %386 = vsyncpa [#allocation3 + $0x1], 1 }
 0x173   :  { %387 = vsyncpa [#allocation4], 1 }
 0x174   :  { %389 = vsyncpa [#allocation4 + $0x1], 1 }

</bundles_post_ra>
